<compile_context>
chip_gen: v6e
topology: v6e:2x2x1
jax: 0.10.0
libtpu: 0.0.40
codegen_flags: <defaults>
</compile_context>

<pallas_src>
import functools

import jax
import jax.numpy as jnp
from jax import lax
from jax.experimental import pallas as pl
from jax.experimental.pallas import tpu as pltpu


def _round_up(x, m):
    return (x + m - 1) // m * m


_LANE = 128
_SUBLANE = 8

# Tile caps.  Worst-case resident VMEM:
#   2*(512*2048*2 + 2048*1024*2 + 512*1024*4) + 512*128*4  ~= 16.5 MiB
_MAX_TB = 512    # batch tile
_MAX_TK = 2048   # feature (reduction) tile
_MAX_TC = 1024   # class (output-lane) tile


def _largest_aligned_divisor(total, align, cap):
    """Largest multiple of `align` that divides `total` (itself a multiple of
    `align`) and is <= cap.  Falls back to `align`."""
    m = total // align
    best = 1
    for q in range(1, m + 1):
        if q * align > cap:
            break
        if m % q == 0:
            best = q
    return best * align


def _prototype_kernel(x_ref, wt_ref, o_ref, sq_ref, *, inv_tau):
    # x_ref:  [TB, TK] bf16  current K slice of the batch tile
    # wt_ref: [TK, TC] bf16  current K slice of the pre-transposed weight
    # o_ref:  [TB, TC] f32   output tile; resident across K (index_map is
    #                        invariant in k), so it doubles as the accumulator
    # sq_ref: [TB, 1]  f32   per-row sum(x^2) accumulator (VMEM scratch)
    k = pl.program_id(2)

    @pl.when(k == 0)
    def _init():
        o_ref[...] = jnp.zeros_like(o_ref)
        sq_ref[...] = jnp.zeros_like(sq_ref)

    # Per-row sum of squares in f32 (VPU/XLU work, hidden under MXU/DMA).
    # It is recomputed once per C tile; hoisting it out of the C loop would
    # require making that axis "arbitrary" (losing megacore sharding) for a
    # minor, DMA-hidden win, so we keep the recompute.
    xf = x_ref[...].astype(jnp.float32)
    sq_ref[...] += jnp.sum(xf * xf, axis=-1, keepdims=True)

    # bf16 MXU matmul, f32 accumulation directly into the resident out tile.
    o_ref[...] += jnp.dot(x_ref[...], wt_ref[...],
                          preferred_element_type=jnp.float32)

    @pl.when(k == pl.num_programs(2) - 1)
    def _finalize():
        # F.normalize: x / max(||x||, 1e-12) == x * rsqrt(max(sum x^2, 1e-24)).
        # Fold 1/tau into the same per-row scale (EUP rsqrt + one VPU mul).
        scale = lax.rsqrt(jnp.maximum(sq_ref[...], 1e-24)) * inv_tau
        o_ref[...] = o_ref[...] * scale


def prepare_prototype_weight(weight, dtype=jnp.bfloat16):
    """One-time prep at init: transpose to [D, C], pad to 128-aligned extents
    only (not tile multiples), cast to bf16.

    weight: [C, D] (rows already L2-normalized by weight_norm()).
    Returns [D_pad, C_pad] `dtype` array, zero padded (padding contributes 0).
    """
    # TODO(synk): generation-specific narrower weight storage (int8 on
    # v5e/v6e, fp8 on v7x, with the dequant scale folded into the finalize
    # pass) would halve the dominant HBM stream again; kept bf16 here for
    # portability / numerical safety.
    c, d = weight.shape
    d_pad = _round_up(d, _LANE)
    c_pad = _round_up(c, _LANE)
    wt = jnp.zeros((d_pad, c_pad), dtype=dtype)
    wt = wt.at[:d, :c].set(weight.T.astype(dtype))
    return wt


def prototype_forward(x, wt_prepared, num_classes, tau=0.05):
    """x: [B, D] float, wt_prepared: [D_pad, C_pad] from prepare_prototype_weight."""
    b, d = x.shape
    d_pad, c_pad = wt_prepared.shape
    assert d_pad >= d and c_pad >= num_classes
    assert d_pad % _LANE == 0 and c_pad % _LANE == 0

    # tk / tc: largest 128-aligned divisors of the (128-aligned) padded extents.
    tk = _largest_aligned_divisor(d_pad, _LANE, _MAX_TK)
    tc = _largest_aligned_divisor(c_pad, _LANE, _MAX_TC)

    # Largest batch tile: the [D_pad, C_pad] weight is re-streamed from HBM
    # once per B tile, so fewer/bigger B tiles directly cut the dominant
    # traffic of this bandwidth-bound skinny GEMM.  B <= _MAX_TB stays a
    # single tile.
    tb = min(_MAX_TB, _round_up(b, _SUBLANE))
    b_pad = _round_up(b, tb)

    # v7x has 2 TensorCores: if the grid exposes only one parallel (B x C)
    # tile, split C (never below 128) so each core streams a disjoint half of
    # the weight; on single-core chips the only cost is extra x re-reads.
    if (b_pad // tb) * (c_pad // tc) == 1 and c_pad >= 2 * _LANE:
        tc = _largest_aligned_divisor(c_pad, _LANE, c_pad // 2)

    # Stream x in bf16.  Zero padding is exact: padded features add 0 to both
    # x.W and sum(x^2); padded rows give 0 logits and are sliced off below.
    x = x.astype(jnp.bfloat16)
    if (b_pad, d_pad) != (b, d):
        x = jnp.pad(x, ((0, b_pad - b), (0, d_pad - d)))

    grid = (b_pad // tb, c_pad // tc, d_pad // tk)
    kernel = functools.partial(_prototype_kernel, inv_tau=1.0 / tau)

    # Resident VMEM: double-buffered x / wt / out tiles + sq scratch.
    # Keep the explicit limit well below v7x's 64 MiB physical VMEM per TC.
    vmem_bytes = 2 * (tb * tk * 2 + tk * tc * 2 + tb * tc * 4) + tb * _LANE * 4
    vmem_limit = min(48 << 20, max(32 << 20, vmem_bytes + (8 << 20)))

    out = pl.pallas_call(
        kernel,
        out_shape=jax.ShapeDtypeStruct((b_pad, c_pad), jnp.float32),
        grid_spec=pltpu.PrefetchScalarGridSpec(
            num_scalar_prefetch=0,
            grid=grid,
            in_specs=[
                pl.BlockSpec((tb, tk), lambda i, j, k: (i, k)),   # x slice
                pl.BlockSpec((tk, tc), lambda i, j, k: (k, j)),   # weight slice
                # NOTE: if per-step weight DMA latency is ever exposed with a
                # small K-step count, pipeline_mode=pl.Buffered(3) on the
                # weight spec is the cheap fix (VMEM headroom is ample).
            ],
            out_specs=pl.BlockSpec((tb, tc), lambda i, j, k: (i, j)),
            scratch_shapes=[
                pltpu.VMEM((tb, 1), jnp.float32),   # sum(x^2) accumulator
            ],
        ),
        compiler_params=pltpu.CompilerParams(
            dimension_semantics=("parallel", "parallel", "arbitrary"),
            vmem_limit_bytes=vmem_limit,
        ),
    )(x, wt_prepared)

    return out[:b, :num_classes]


def make_prototype_params(key, num_classes, input_size):
    # nn.Linear default init (uniform +-1/sqrt(D)) followed by weight_norm().
    bound = 1.0 / jnp.sqrt(jnp.float32(input_size))
    w = jax.random.uniform(
        key, (num_classes, input_size), dtype=jnp.float32,
        minval=-bound, maxval=bound,
    )
    norm = jnp.sqrt(jnp.sum(w * w, axis=1, keepdims=True))
    return w / norm


def prototype_reference(x, weight, tau=0.05):
    # Pure-JAX f32 reference of the PyTorch forward.
    norm = jnp.sqrt(jnp.sum(x * x, axis=1, keepdims=True))
    x_n = x / jnp.maximum(norm, 1e-12)
    return (x_n @ weight.T) / tau


if __name__ == "__main__":
    key = jax.random.PRNGKey(0)
    k_w, k_x = jax.random.split(key)

    batch = 8
    input_size = 32
    num_classes = 16
    tau = 0.05

    weight = make_prototype_params(k_w, num_classes, input_size)
    x = jax.random.normal(k_x, (batch, input_size), dtype=jnp.float32)

    wt_prepared = prepare_prototype_weight(weight)       # once, at "init"
    out = prototype_forward(x, wt_prepared, num_classes, tau)
    out = jax.block_until_ready(out)

    ref = prototype_reference(x, weight, tau)
    assert out.shape == (batch, num_classes)
    # bf16 MXU operands (x and W) -> relaxed tolerance vs the pure-f32 reference.
    assert jnp.allclose(out, ref, atol=0.15, rtol=0.02), (
        "mismatch vs reference: max abs diff = "
        f"{float(jnp.max(jnp.abs(out - ref)))}")

    print("KERNEL_OK")
</pallas_src>

<mosaic_0001>
module attributes {stable_mosaic.version = 11 : i64} {
  func.func @_prototype_kernel(%arg0: i32, %arg1: i32, %arg2: i32, %arg3: memref<8x128xbf16, #tpu.memory_space<vmem>>, %arg4: memref<128x128xbf16, #tpu.memory_space<vmem>>, %arg5: memref<8x128xf32, #tpu.memory_space<vmem>>, %arg6: memref<8x1xf32, #tpu.memory_space<vmem>>) attributes {dimension_semantics = [#tpu.dimension_semantics<parallel>, #tpu.dimension_semantics<parallel>, #tpu.dimension_semantics<arbitrary>], iteration_bounds = array<i64: 1, 1, 1>, scalar_prefetch = 0 : i64, scratch_operands = 1 : i64, tpu.core_type = #tpu.core_type<tc>, window_params = [{transform_indices = @transform_0, window_bounds = array<i64: 8, 128>}, {transform_indices = @transform_1, window_bounds = array<i64: 128, 128>}, {transform_indices = @transform_2, window_bounds = array<i64: 8, 128>}]} {
    %c0_i32 = arith.constant 0 : i32
    %0 = arith.cmpi eq, %arg2, %c0_i32 : i32
    %1 = arith.extui %0 : i1 to i32
    %c0_i32_0 = arith.constant 0 : i32
    %2 = arith.cmpi ne, %1, %c0_i32_0 : i32
    scf.if %2 {
      %cst_17 = arith.constant 0.000000e+00 : f32
      %20 = vector.broadcast %cst_17 : f32 to vector<8x128xf32>
      %c0_18 = arith.constant 0 : index
      %c0_19 = arith.constant 0 : index
      %21 = vector.load %arg5[%c0_18, %c0_19] : memref<8x128xf32, #tpu.memory_space<vmem>>, vector<8x128xf32>
      tpu.vector_store %arg5[%c0_18, %c0_19], %20 {strides = array<i32>} : memref<8x128xf32, #tpu.memory_space<vmem>>, vector<8x128xf32>,
      %cst_20 = arith.constant 0.000000e+00 : f32
      %22 = vector.broadcast %cst_20 : f32 to vector<8x1xf32>
      %c0_21 = arith.constant 0 : index
      %c0_22 = arith.constant 0 : index
      %23 = vector.load %arg6[%c0_21, %c0_22] : memref<8x1xf32, #tpu.memory_space<vmem>>, vector<8x1xf32>
      tpu.vector_store %arg6[%c0_21, %c0_22], %22 {strides = array<i32>} : memref<8x1xf32, #tpu.memory_space<vmem>>, vector<8x1xf32>,
    } else {
    }
    %c0 = arith.constant 0 : index
    %c0_1 = arith.constant 0 : index
    %3 = vector.load %arg3[%c0, %c0_1] : memref<8x128xbf16, #tpu.memory_space<vmem>>, vector<8x128xbf16>
    %4 = arith.extf %3 : vector<8x128xbf16> to vector<8x128xf32>
    %c0_2 = arith.constant 0 : index
    %c0_3 = arith.constant 0 : index
    %5 = vector.load %arg6[%c0_2, %c0_3] : memref<8x1xf32, #tpu.memory_space<vmem>>, vector<8x1xf32>
    %6 = arith.mulf %4, %4 : vector<8x128xf32>
    %cst = arith.constant dense<0.000000e+00> : vector<8xf32>
    %7 = vector.multi_reduction <add>, %6, %cst [1] : vector<8x128xf32> to vector<8xf32>
    %8 = vector.shape_cast %7 : vector<8xf32> to vector<8x1xf32>
    %9 = arith.addf %5, %8 : vector<8x1xf32>
    %c0_4 = arith.constant 0 : index
    %c0_5 = arith.constant 0 : index
    %10 = vector.load %arg6[%c0_4, %c0_5] : memref<8x1xf32, #tpu.memory_space<vmem>>, vector<8x1xf32>
    tpu.vector_store %arg6[%c0_4, %c0_5], %9 {strides = array<i32>} : memref<8x1xf32, #tpu.memory_space<vmem>>, vector<8x1xf32>,
    %c0_6 = arith.constant 0 : index
    %c0_7 = arith.constant 0 : index
    %11 = vector.load %arg5[%c0_6, %c0_7] : memref<8x128xf32, #tpu.memory_space<vmem>>, vector<8x128xf32>
    %c0_8 = arith.constant 0 : index
    %c0_9 = arith.constant 0 : index
    %12 = vector.load %arg3[%c0_8, %c0_9] : memref<8x128xbf16, #tpu.memory_space<vmem>>, vector<8x128xbf16>
    %c0_10 = arith.constant 0 : index
    %c0_11 = arith.constant 0 : index
    %13 = vector.load %arg4[%c0_10, %c0_11] : memref<128x128xbf16, #tpu.memory_space<vmem>>, vector<128x128xbf16>
    %cst_12 = arith.constant dense<0.000000e+00> : vector<8x128xf32>
    %14 = tpu.matmul %12, %13, %cst_12 {dimension_numbers = #tpu.dot_dimension_numbers<[1], [0], [0], [1], [0, 0, 1, 1], [], []>} : vector<8x128xbf16>, vector<128x128xbf16>, vector<8x128xf32> -> vector<8x128xf32>
    %15 = arith.addf %11, %14 : vector<8x128xf32>
    %c0_13 = arith.constant 0 : index
    %c0_14 = arith.constant 0 : index
    %16 = vector.load %arg5[%c0_13, %c0_14] : memref<8x128xf32, #tpu.memory_space<vmem>>, vector<8x128xf32>
    tpu.vector_store %arg5[%c0_13, %c0_14], %15 {strides = array<i32>} : memref<8x128xf32, #tpu.memory_space<vmem>>, vector<8x128xf32>,
    %c0_i32_15 = arith.constant 0 : i32
    %17 = arith.cmpi eq, %arg2, %c0_i32_15 : i32
    %18 = arith.extui %17 : i1 to i32
    %c0_i32_16 = arith.constant 0 : i32
    %19 = arith.cmpi ne, %18, %c0_i32_16 : i32
    scf.if %19 {
      %c0_17 = arith.constant 0 : index
      %c0_18 = arith.constant 0 : index
      %20 = vector.load %arg6[%c0_17, %c0_18] : memref<8x1xf32, #tpu.memory_space<vmem>>, vector<8x1xf32>
      %cst_19 = arith.constant 1.000000e-24 : f32
      %21 = vector.broadcast %cst_19 : f32 to vector<8x1xf32>
      %22 = arith.maximumf %20, %21 : vector<8x1xf32>
      %23 = math.rsqrt %22 : vector<8x1xf32>
      %cst_20 = arith.constant 2.000000e+01 : f32
      %24 = vector.broadcast %cst_20 : f32 to vector<8x1xf32>
      %25 = arith.mulf %23, %24 : vector<8x1xf32>
      %c0_21 = arith.constant 0 : index
      %c0_22 = arith.constant 0 : index
      %26 = vector.load %arg5[%c0_21, %c0_22] : memref<8x128xf32, #tpu.memory_space<vmem>>, vector<8x128xf32>
      %27 = vector.broadcast %25 : vector<8x1xf32> to vector<8x128xf32>
      %28 = arith.mulf %26, %27 : vector<8x128xf32>
      %c0_23 = arith.constant 0 : index
      %c0_24 = arith.constant 0 : index
      %29 = vector.load %arg5[%c0_23, %c0_24] : memref<8x128xf32, #tpu.memory_space<vmem>>, vector<8x128xf32>
      tpu.vector_store %arg5[%c0_23, %c0_24], %28 {strides = array<i32>} : memref<8x128xf32, #tpu.memory_space<vmem>>, vector<8x128xf32>,
    } else {
    }
    return
  }
  func.func @transform_0(%arg0: i32, %arg1: i32, %arg2: i32) -> (i32, i32) {
    %c0_i32 = arith.constant 0 : i32
    return %arg0, %arg2 : i32, i32
  }
  func.func @transform_1(%arg0: i32, %arg1: i32, %arg2: i32) -> (i32, i32) {
    %c0_i32 = arith.constant 0 : i32
    return %arg2, %arg1 : i32, i32
  }
  func.func @transform_2(%arg0: i32, %arg1: i32, %arg2: i32) -> (i32, i32) {
    %c0_i32 = arith.constant 0 : i32
    return %arg0, %arg1 : i32, i32
  }
}

</mosaic_0001>

<bundles_post_ra>
// kernel: tpu_custom_call.1
= control target key start
LH: loop header
LB: loop body
LE: loop exit
PB: predicated region body
PF: predicated region fallthrough
CT: control target
= control target key end

     0   :  { %7 = vsyncpa [#allocation4], 0  ;;  %s350_s0 = inlined_call_operand.hbm [shape: bf16[8,128], index: 0, kind: input, shape index: {}]   ;;  %s351_s1 = inlined_call_operand.hbm [shape: bf16[128,128], index: 1, kind: input, shape index: {}]   ;;  %s352_s2 = inlined_call_operand.hbm [shape: f32[8,128], index: 2, kind: output, shape index: {}]  }
   0x1   :  { %8 = vsyncpa [#allocation7], 0 }
   0x2   :  { %9 = vsyncpa [#allocation5], 0  ;;  %s316_s9 = smov [#allocation3]   ;;  %s317_s11 = smov [#allocation6]  }
   0x3   :  { %s16_s10 = sshll.u32 %s316_s9, 4  ;;  %s25_s12 = sshll.u32 %s317_s11, 4  ;;  %s17_s10 = int_to_ptr.vmem [resolvable:$true] %s16_s10  ;;  %s26_s12 = int_to_ptr.vmem [resolvable:$true] %s25_s12 }
   0x4   :  { %s258_s13 = scalar_lea.vmem %s17_s10, 64  ;;  %p263_p1 = scmp.lt.s32.totalorder %s17_s10, %s17_s10 }
   0x5   :  { %p259_p0 = scmp.ne.s32.totalorder %s17_s10, %s258_s13  ;;  %p264_p2 = scmp.lt.s32.totalorder %s258_s13, %s258_s13 }
   0x7   :  { %p265_p3 = por %p264_p2, %p263_p1 }
   0x9   :  { %p266_p4 = pnand %p265_p3, %p259_p0 }
   0xb   :  { %269 = shalt.err (!%p266_p4)
}
   0xc   :  { %19 = dma.hbm_to_vmem [thread:$0]  %s350_s0, 64, %s17_s10, [#allocation4]  }
   0xd   :  { %s278_s16 = scalar_lea.vmem %s26_s12, 1024  ;;  %p283_p6 = scmp.lt.s32.totalorder %s26_s12, %s26_s12 }
   0xe   :  { %p279_p5 = scmp.ne.s32.totalorder %s26_s12, %s278_s16  ;;  %p284_p7 = scmp.lt.s32.totalorder %s278_s16, %s278_s16 }
  0x10   :  { %p285_p8 = por %p284_p7, %p283_p6 }
  0x12   :  { %p286_p9 = pnand %p285_p8, %p279_p5 }
  0x14   :  { %289 = shalt.err (!%p286_p9)
}
  0x15   :  { %s318_s17 = smov 64   ;;  %s319_s18 = smov 4  }
  0x16   :  { %31 = dma.hbm_to_vmem [thread:$0]  %s351_s1, 1024, %s26_s12, [#allocation7], %s318_s17, %s318_s17, %s319_s18  }
  0x17   :  { %310 = dma.done.wait [#allocation4], 64  }
  0x18   :  { %311 = vsyncadd [#allocation4], 4294967232 }
  0x19   :  { %312 = dma.done.wait [#allocation7], 1024  }
  0x1a   :  { %313 = vsyncadd [#allocation7], 4294966272  ;;  %vm44_vm0 = vcmask 7168   ;;  %v320_v0 = vmov 0.0   ;;  %vm321_vm1 = vmmov 0   ;;  %v240_v3 = vld [vmem:[#allocation6 + $0x38] sm:$0xff]  }
  0x1b   :  { %211 = vmatprep.subr.bf16.mxu0 %v320_v0  ;;  %227 = vmatprep.mubr.msk.bf16.mxu0 %vm321_vm1, %v320_v0  ;;  %45 = vst.msk [vmem:[#allocation2] sm:$0xff] %vm44_vm0, %v320_v0  ;;  %v46_v1 = vld [vmem:[#allocation3] sm:$0xf]  ;;  %v241_v5 = vld [vmem:[#allocation6 + $0x30] sm:$0xff]   ;;  %v242_v6 = vld [vmem:[#allocation6 + $0x28] sm:$0xff]   ;;  %v322_v9 = vmov 0  }
  0x1c   :  { %v47_v2 = vunpack.c.l.bf16 %v46_v1  ;;  %212 = vmatpush3.bf16.msra.mxu0 %v240_v3  ;;  %v243_v7 = vld [vmem:[#allocation6 + $0x20] sm:$0xff]   ;;  %v244_v8 = vld [vmem:[#allocation6 + $0x18] sm:$0xff]   ;;  %239 = vset.pattern.permute.xlu0 %v322_v9  ;;  %v245_v10 = vld [vmem:[#allocation6 + $0x10] sm:$0xff]   ;;  %s323_s0 = smov [#allocation8]  }
  0x1d   :  { %213 = vmatprep.subr.bf16.mxu0 %v320_v0  ;;  %v246_v11 = vld [vmem:[#allocation6 + $0x8] sm:$0xff]   ;;  %v247_v12 = vld [vmem:[#allocation6] sm:$0xff]   ;;  %v56_v13 = vld [vmem:[#allocation3] sm:$0xf]  ;;  %s184_s1 = sshll.u32 %s323_s0, 4  ;;  %s185_s1 = int_to_ptr.vmem [resolvable:$true] %s184_s1 }
  0x1e   :  { %v49_v4 = vmul.f32 %v47_v2, %v47_v2  ;;  %s290_s21 = scalar_lea.vmem %s185_s1, 128  ;;  %p295_p11 = scmp.lt.s32.totalorder %s185_s1, %s185_s1 }
  0x1f   :  { %p291_p10 = scmp.ne.s32.totalorder %s185_s1, %s290_s21  ;;  %p296_p12 = scmp.lt.s32.totalorder %s290_s21, %s290_s21 }
  0x20   :  { %50 = vadd.xlane.f32.xlu0 %v49_v4  ;;  %214 = vmatpush3.bf16.msra.mxu0 %v241_v5 }
  0x21   :  { %215 = vmatprep.subr.bf16.mxu0 %v320_v0  ;;  %p297_p13 = por %p296_p12, %p295_p11 }
  0x22   :  { %v48_v14 = vld [vmem:[#allocation2] sm:$0xff] }
  0x23   :  { %p298_p0 = pnand %p297_p13, %p291_p10 }
  0x24   :  { %216 = vmatpush3.bf16.msra.mxu0 %v242_v6 }
  0x25   :  { %217 = vmatprep.subr.bf16.mxu0 %v320_v0 }
  0x28   :  { %218 = vmatpush3.bf16.msra.mxu0 %v243_v7 }
  0x29   :  { %219 = vmatprep.subr.bf16.mxu0 %v320_v0 }
  0x2c   :  { %220 = vmatpush3.bf16.msra.mxu0 %v244_v8 }
  0x2d   :  { %221 = vmatprep.subr.bf16.mxu0 %v320_v0 }
  0x30   :  { %222 = vmatpush3.bf16.msra.mxu0 %v245_v10 }
  0x31   :  { %223 = vmatprep.subr.bf16.mxu0 %v320_v0 }
  0x34   :  { %224 = vmatpush3.bf16.msra.mxu0 %v246_v11 }
  0x35   :  { %225 = vmatprep.subr.bf16.mxu0 %v320_v0 }
  0x38   :  { %226 = vmatpush3.bf16.msra.mxu0 %v247_v12 }
  0x3b   :  { %228 = vmatmul.mubr.bf16.vlgmr.msra.gmra.mxu0 %v56_v13 }
  0xa9   :  { %v51_v15 = vpop.xlane.xlu0 %50 }
  0xaa   :  { %v52_v16 = vadd.f32 %v51_v15, %v48_v14 }
  0xac   :  { %54 = vst.msk [vmem:[#allocation2] sm:$0xff] %vm44_vm0, %v52_v16 }
  0xb3   :  { %v166_v17 = vld [vmem:[#allocation2] sm:$0xff] }
  0xb4   :  { %v167_v18 = vmax.f32 %v166_v17, 1e-24 }
  0xb6   :  { %248 = vrsqrt.f32 %v167_v18 }
  0xc3   :  { %v249_v19 = vpop.eup %248 }
  0xc4   :  { %v169_v20 = vmul.f32 20.0, %v249_v19 }
  0xc6   :  { %173 = vperm.xlu0 %239, %v169_v20  }
  0xfb   :  { %v155_v21 = vpop.f32.mrf.mxu0 }
  0xfd   :  { %v229_v22 = vpop.f32.mrf.mxu0 }
  0xff   :  { %v158_v23 = vpop.f32.mrf.mxu0 }
 0x101   :  { %v230_v24 = vpop.f32.mrf.mxu0 }
 0x141   :  { %v174_v25 = vpop.permute.xlu0 %173 }
 0x142   :  { %v176_v26 = vmul.f32 %v174_v25, %v155_v21 }
 0x144   :  { %177 = vst [vmem:[#allocation8] sm:$0xff] %v176_v26 }
 0x145   :  { %301 = shalt.err (!%p298_p0)
}
 0x146   :  { %187 = dma.vmem_to_hbm [thread:$0]  %s185_s1, 128, %s352_s2, [#allocation5]  }
 0x147   :  { %314 = dma.done.wait [#allocation5], 128  }
 0x148   :  { %315 = vsyncadd [#allocation5], 4294967168 }
 0x149   :  { %191 = vsyncpa [#allocation4], 1 }
 0x14a   :  { %192 = vsyncpa [#allocation7], 1 }
 0x14b   :  { %193 = vsyncpa [#allocation5], 1 }

</bundles_post_ra>
